<compile_context>
chip_gen: v6e
topology: v6e:2x2x1
jax: 0.10.0
libtpu: 0.0.40
codegen_flags: <defaults>
</compile_context>

<pallas_src>
import functools

import jax
import jax.numpy as jnp
from jax.experimental import pallas as pl
from jax.experimental.pallas import tpu as pltpu

SUBLANE = 8
MAX_TILE_M = 2048   # 2048 rows * (32-in + 24-out) * 4B ~= 0.44 MiB per in/out tile


def _round_up(n, m):
    return ((n + m - 1) // m) * m


def point_decoder_kernel(x_ref, w1_ref, b1_ref, w2_ref, b2_ref, o_ref):
    # Both Linear layers in f32 (matches the PyTorch reference). Accumulation
    # is f32 on the MXU; bias-add + ReLU run on the VPU.
    h = jnp.dot(x_ref[...], w1_ref[...], preferred_element_type=jnp.float32)
    h = jnp.maximum(h + b1_ref[...], 0.0)                      # (TM, H)
    o = jnp.dot(h, w2_ref[...], preferred_element_type=jnp.float32)
    o = jnp.maximum(o + b2_ref[...], 0.0)                      # (TM, OUT)
    o_ref[...] = o.astype(o_ref.dtype)


def prepare_params(w1, b1, w2, b2):
    """Weights in (in_features, out_features) layout, f32; biases as (1, n) f32.
    No output-lane padding and no dtype downcast (see perf review)."""
    e, h = w1.shape
    h2, out_dim = w2.shape
    assert h2 == h
    return (w1.astype(jnp.float32),
            b1.reshape(1, -1).astype(jnp.float32),
            w2.astype(jnp.float32),
            b2.reshape(1, -1).astype(jnp.float32))


@functools.partial(jax.jit, static_argnames=("tile_m",))
def _point_decoder_pallas(xp, w1, b1, w2, b2, *, tile_m):
    """xp: (Bp, E) with Bp a multiple of tile_m. Returns (Bp, OUT) f32."""
    bp, e = xp.shape
    h = w1.shape[1]
    out_dim = w2.shape[1]
    grid = (bp // tile_m,)
    return pl.pallas_call(
        point_decoder_kernel,
        out_shape=jax.ShapeDtypeStruct((bp, out_dim), jnp.float32),
        grid_spec=pltpu.PrefetchScalarGridSpec(
            num_scalar_prefetch=0,
            grid=grid,
            in_specs=[
                pl.BlockSpec((tile_m, e), lambda i: (i, 0)),       # x: tiled over batch
                pl.BlockSpec((e, h), lambda i: (0, 0)),            # W1: VMEM-resident
                pl.BlockSpec((1, h), lambda i: (0, 0)),            # b1: VMEM-resident
                pl.BlockSpec((h, out_dim), lambda i: (0, 0)),      # W2: VMEM-resident
                pl.BlockSpec((1, out_dim), lambda i: (0, 0)),      # b2: VMEM-resident
            ],
            # Last dim == full array dim (24), so this narrow block is legal;
            # writing only the real 24 columns cuts HBM writeback ~5.3x vs the
            # old 128-lane padded output.
            out_specs=pl.BlockSpec((tile_m, out_dim), lambda i: (i, 0)),
        ),
        compiler_params=pltpu.CompilerParams(
            # Batch axis is embarrassingly parallel -> shards across v7x's 2 TCs.
            dimension_semantics=("parallel",),
        ),
    )(xp, w1, b1, w2, b2)


def _choose_tiling(b):
    """Pick (padded_batch, tile_m): large tiles (up to MAX_TILE_M rows) to
    amortize per-grid-step overhead, >= 2 grid steps when possible so both v7x
    TensorCores get work, and at most a few pad rows ever materialized."""
    bp = _round_up(max(b, SUBLANE), SUBLANE)
    if bp <= 2 * SUBLANE:
        return bp, bp                       # single tiny tile
    n_tiles = max(2, pl.cdiv(bp, MAX_TILE_M))
    tile_m = _round_up(pl.cdiv(bp, n_tiles), SUBLANE)
    return n_tiles * tile_m, tile_m


def point_decoder_batched(x, params, *, num_decoding, dimension):
    """x: (B, E) f32 -> (B, num_decoding, dimension) f32."""
    w1, b1, w2, b2 = params
    out_dim = w2.shape[1]
    assert out_dim == num_decoding * dimension
    b, e = x.shape
    bp, tile_m = _choose_tiling(b)
    if bp == b:
        xp = x                              # no padding copy needed
    else:
        xp = jnp.zeros((bp, e), x.dtype).at[:b].set(x)
    out = _point_decoder_pallas(xp, w1, b1, w2, b2, tile_m=tile_m)
    if bp != b:
        out = out[:b]
    return out.reshape(b, num_decoding, dimension)


def point_decoder_forward(x, params, *, num_decoding, dimension):
    """Exact PyTorch PointDecoder.forward semantics: single embedding (E,) or
    (1, E) -> (num_decoding, dimension). Runs in plain XLA: a batch-1 GEMV
    through pallas_call is pure launch/DMA overhead (per perf review)."""
    w1, b1, w2, b2 = params
    xr = x.reshape(1, -1).astype(jnp.float32)
    h = jnp.maximum(xr @ w1 + b1, 0.0)
    o = jnp.maximum(h @ w2 + b2, 0.0)
    return o.reshape(num_decoding, dimension)


def init_params(key, embedding_size, hdim, out_dim):
    """Deterministic init mimicking torch.nn.Linear's U(-1/sqrt(fan_in), 1/sqrt(fan_in))."""
    k1, k2, k3, k4 = jax.random.split(key, 4)
    lim1 = 1.0 / jnp.sqrt(embedding_size)
    lim2 = 1.0 / jnp.sqrt(hdim)
    w1 = jax.random.uniform(k1, (embedding_size, hdim), jnp.float32, -lim1, lim1)
    b1 = jax.random.uniform(k2, (1, hdim), jnp.float32, -lim1, lim1)
    w2 = jax.random.uniform(k3, (hdim, out_dim), jnp.float32, -lim2, lim2)
    b2 = jax.random.uniform(k4, (1, out_dim), jnp.float32, -lim2, lim2)
    return w1, b1, w2, b2


def _reference(x, w1, b1, w2, b2, num_decoding, dimension):
    """Plain-JAX f32 reference (PyTorch-equivalent math)."""
    h = jnp.maximum(x @ w1 + b1, 0.0)
    o = jnp.maximum(h @ w2 + b2, 0.0)
    return o.reshape(x.shape[0], num_decoding, dimension)


if __name__ == "__main__":
    # Shapes consistent with PointDecoder(dimension=3, embedding_size=32,
    # num_decoding=8, hdim=64, lnum=2).
    dimension = 3
    embedding_size = 32
    num_decoding = 8
    hdim = 64
    out_dim = dimension * num_decoding
    batch = 256          # -> grid=(2,), tile_m=128, no padding copy

    key = jax.random.PRNGKey(0)
    kx, kp = jax.random.split(key)
    xb = jax.random.normal(kx, (batch, embedding_size), jnp.float32)
    w1, b1, w2, b2 = init_params(kp, embedding_size, hdim, out_dim)
    params = prepare_params(w1, b1, w2, b2)

    # --- Batched kernel run (no pad copy path) ---
    out_b = point_decoder_batched(xb, params,
                                  num_decoding=num_decoding, dimension=dimension)
    out_b = jax.block_until_ready(out_b)
    assert out_b.shape == (batch, num_decoding, dimension)
    ref = _reference(xb, w1, b1, w2, b2, num_decoding, dimension)
    assert jnp.allclose(out_b, ref, atol=5e-3, rtol=5e-3), "batched mismatch"

    # --- Ragged batch (exercises the minimal-padding path: b=20 -> bp=32) ---
    xs = jax.random.normal(jax.random.PRNGKey(1), (20, embedding_size), jnp.float32)
    out_s = point_decoder_batched(xs, params,
                                  num_decoding=num_decoding, dimension=dimension)
    out_s = jax.block_until_ready(out_s)
    ref_s = _reference(xs, w1, b1, w2, b2, num_decoding, dimension)
    assert out_s.shape == (20, num_decoding, dimension)
    assert jnp.allclose(out_s, ref_s, atol=5e-3, rtol=5e-3), "ragged mismatch"

    # --- Single-embedding path: exact PyTorch forward() semantics/shape ---
    out1 = point_decoder_forward(xb[0], params,
                                 num_decoding=num_decoding, dimension=dimension)
    out1 = jax.block_until_ready(out1)
    assert out1.shape == (num_decoding, dimension)
    assert jnp.allclose(out1, ref[0], atol=5e-3, rtol=5e-3), "single mismatch"

    print("KERNEL_OK")
</pallas_src>

<mosaic_0001>
module attributes {stable_mosaic.version = 11 : i64} {
  func.func @point_decoder_kernel(%arg0: i32, %arg1: memref<128x32xf32, #tpu.memory_space<vmem>>, %arg2: memref<32x64xf32, #tpu.memory_space<vmem>>, %arg3: memref<1x64xf32, #tpu.memory_space<vmem>>, %arg4: memref<64x24xf32, #tpu.memory_space<vmem>>, %arg5: memref<1x24xf32, #tpu.memory_space<vmem>>, %arg6: memref<128x24xf32, #tpu.memory_space<vmem>>) attributes {dimension_semantics = [#tpu.dimension_semantics<parallel>], iteration_bounds = array<i64: 2>, scalar_prefetch = 0 : i64, scratch_operands = 0 : i64, tpu.core_type = #tpu.core_type<tc>, window_params = [{transform_indices = @transform_0, window_bounds = array<i64: 128, 32>}, {pipeline_mode = #tpu.pipeline_mode<synchronous>, transform_indices = @transform_1, window_bounds = array<i64: 32, 64>}, {pipeline_mode = #tpu.pipeline_mode<synchronous>, transform_indices = @transform_2, window_bounds = array<i64: 1, 64>}, {pipeline_mode = #tpu.pipeline_mode<synchronous>, transform_indices = @transform_3, window_bounds = array<i64: 64, 24>}, {pipeline_mode = #tpu.pipeline_mode<synchronous>, transform_indices = @transform_4, window_bounds = array<i64: 1, 24>}, {transform_indices = @transform_5, window_bounds = array<i64: 128, 24>}]} {
    %c0 = arith.constant 0 : index
    %c0_0 = arith.constant 0 : index
    %0 = vector.load %arg1[%c0, %c0_0] : memref<128x32xf32, #tpu.memory_space<vmem>>, vector<128x32xf32>
    %c0_1 = arith.constant 0 : index
    %c0_2 = arith.constant 0 : index
    %1 = vector.load %arg2[%c0_1, %c0_2] : memref<32x64xf32, #tpu.memory_space<vmem>>, vector<32x64xf32>
    %cst = arith.constant dense<0.000000e+00> : vector<128x64xf32>
    %2 = tpu.matmul %0, %1, %cst {dimension_numbers = #tpu.dot_dimension_numbers<[1], [0], [0], [1], [0, 0, 1, 1], [], []>} : vector<128x32xf32>, vector<32x64xf32>, vector<128x64xf32> -> vector<128x64xf32>
    %c0_3 = arith.constant 0 : index
    %c0_4 = arith.constant 0 : index
    %3 = vector.load %arg3[%c0_3, %c0_4] : memref<1x64xf32, #tpu.memory_space<vmem>>, vector<1x64xf32>
    %4 = vector.broadcast %3 : vector<1x64xf32> to vector<128x64xf32>
    %5 = arith.addf %2, %4 : vector<128x64xf32>
    %cst_5 = arith.constant 0.000000e+00 : f32
    %6 = vector.broadcast %cst_5 : f32 to vector<128x64xf32>
    %7 = arith.maximumf %5, %6 : vector<128x64xf32>
    %c0_6 = arith.constant 0 : index
    %c0_7 = arith.constant 0 : index
    %8 = vector.load %arg4[%c0_6, %c0_7] : memref<64x24xf32, #tpu.memory_space<vmem>>, vector<64x24xf32>
    %cst_8 = arith.constant dense<0.000000e+00> : vector<128x24xf32>
    %9 = tpu.matmul %7, %8, %cst_8 {dimension_numbers = #tpu.dot_dimension_numbers<[1], [0], [0], [1], [0, 0, 1, 1], [], []>} : vector<128x64xf32>, vector<64x24xf32>, vector<128x24xf32> -> vector<128x24xf32>
    %c0_9 = arith.constant 0 : index
    %c0_10 = arith.constant 0 : index
    %10 = vector.load %arg5[%c0_9, %c0_10] : memref<1x24xf32, #tpu.memory_space<vmem>>, vector<1x24xf32>
    %11 = vector.broadcast %10 : vector<1x24xf32> to vector<128x24xf32>
    %12 = arith.addf %9, %11 : vector<128x24xf32>
    %cst_11 = arith.constant 0.000000e+00 : f32
    %13 = vector.broadcast %cst_11 : f32 to vector<128x24xf32>
    %14 = arith.maximumf %12, %13 : vector<128x24xf32>
    %c0_12 = arith.constant 0 : index
    %c0_13 = arith.constant 0 : index
    %15 = vector.load %arg6[%c0_12, %c0_13] : memref<128x24xf32, #tpu.memory_space<vmem>>, vector<128x24xf32>
    tpu.vector_store %arg6[%c0_12, %c0_13], %14 {strides = array<i32>} : memref<128x24xf32, #tpu.memory_space<vmem>>, vector<128x24xf32>,
    return
  }
  func.func @transform_0(%arg0: i32) -> (i32, i32) {
    %c0_i32 = arith.constant 0 : i32
    %c0_i32_0 = arith.constant 0 : i32
    return %arg0, %c0_i32 : i32, i32
  }
  func.func @transform_1(%arg0: i32) -> (i32, i32) {
    %c0_i32 = arith.constant 0 : i32
    %c0_i32_0 = arith.constant 0 : i32
    %c0_i32_1 = arith.constant 0 : i32
    return %c0_i32, %c0_i32_0 : i32, i32
  }
  func.func @transform_2(%arg0: i32) -> (i32, i32) {
    %c0_i32 = arith.constant 0 : i32
    %c0_i32_0 = arith.constant 0 : i32
    %c0_i32_1 = arith.constant 0 : i32
    return %c0_i32, %c0_i32_0 : i32, i32
  }
  func.func @transform_3(%arg0: i32) -> (i32, i32) {
    %c0_i32 = arith.constant 0 : i32
    %c0_i32_0 = arith.constant 0 : i32
    %c0_i32_1 = arith.constant 0 : i32
    return %c0_i32, %c0_i32_0 : i32, i32
  }
  func.func @transform_4(%arg0: i32) -> (i32, i32) {
    %c0_i32 = arith.constant 0 : i32
    %c0_i32_0 = arith.constant 0 : i32
    %c0_i32_1 = arith.constant 0 : i32
    return %c0_i32, %c0_i32_0 : i32, i32
  }
  func.func @transform_5(%arg0: i32) -> (i32, i32) {
    %c0_i32 = arith.constant 0 : i32
    %c0_i32_0 = arith.constant 0 : i32
    return %arg0, %c0_i32 : i32, i32
  }
}

</mosaic_0001>

<bundles_post_ra>
// kernel: _point_decoder_pallas.1
= control target key start
LH: loop header
LB: loop body
LE: loop exit
PB: predicated region body
PF: predicated region fallthrough
CT: control target
= control target key end

     0   :  { %s986_s18 = smov 0   ;;  %s1154_s0 = inlined_call_operand.vmem [shape: f32[256,32], index: 0, kind: input, shape index: {}]   ;;  %s1155_s1 = inlined_call_operand.vmem [shape: f32[32,64], index: 1, kind: input, shape index: {}]   ;;  %s1156_s2 = inlined_call_operand.vmem [shape: f32[1,64], index: 2, kind: input, shape index: {}]   ;;  %s1157_s3 = inlined_call_operand.vmem [shape: f32[64,24], index: 3, kind: input, shape index: {}]   ;;  %s1158_s4 = inlined_call_operand.vmem [shape: f32[1,24], index: 4, kind: input, shape index: {}]   ;;  %s1159_s5 = inlined_call_operand.vmem [shape: f32[256,24], index: 5, kind: output, shape index: {}]  }
   0x1 LB: > { %s763_s19 = sadd.s32 4294967295, %s954_s18   ;;  %p767_p0 = scmp.ge.s32.totalorder %s954_s18, 1  ;;  %s954_s18 = sphi %s986_s18, %s15_s18  }
   0x2   : > { %p188_p1 = scmp.lt.s32.totalorder %s954_s18, 3 }
   0x4   : > { %p189_p2 = pnand %p767_p0, %p188_p1 }
   0x5   : > { %s768_s24 = sshll.u32 (!%p189_p2), %s763_s19, 4 }
   0x6   : > { %192 = sbr.rel (%p189_p2) target bundleno = 448 (0x1c0), region = 40  ;;  %p217_p3 = scmp.lt.s32.totalorder (!%p189_p2), %s768_s24, 31 }
   0xb   : > { %v247_v0 = vld [vmem:[%s1155_s1 + $0x18] sm:$0xff]  ;;  %v246_v1 = vld [vmem:[%s1155_s1 + $0x10] sm:$0xff]  ;;  %v245_v3 = vld [vmem:[%s1155_s1 + $0x8] sm:$0xff]  ;;  %s1161_s24 = smov (!%p217_p3, %s768_s24), 31  ;;  %vm255_vm0 = vcmask 261120   ;;  %vm480_vm1 = vcmask 523264  }
   0xc   : > { %852 = vmatprep.subr.mxu0 %v247_v0  ;;  %v472_v2 = vld [vmem:[%s1157_s3 + $0x38] sm:$0xff]  ;;  %v471_v4 = vld [vmem:[%s1157_s3 + $0x30] sm:$0xff]  ;;  %v244_v5 = vld [vmem:[%s1155_s1] sm:$0xff]  ;;  %s769_s8 = sshll.u32 %s1161_s24, 3  ;;  %vm690_vm2 = vcmask 195584  }
   0xd   : > { %853 = vmatpush3.msra.mxu0 %v247_v0  ;;  %924 = vmatprep.subr.mxu1 %v472_v2  ;;  %v470_v6 = vld [vmem:[%s1157_s3 + $0x28] sm:$0xff]  ;;  %s1023_s13 = scalar_lea.vmem %s1154_s0, %s769_s8  ;;  %v469_v11 = vld [vmem:[%s1157_s3 + $0x20] sm:$0xff]  ;;  %v468_v24 = vld [vmem:[%s1157_s3 + $0x18] sm:$0xff]  ;;  %s1102_s7 = scalar_lea.vmem %s1159_s5, %s769_s8 }
   0xe   : > { %854 = vmatprep.subr.mxu0 %v246_v1  ;;  %932 = vmatpush3.msra.mxu1 %v472_v2  ;;  %v228_v7 = vld [vmem:[%s1023_s13] sm:$0xff]  ;;  %v229_v8 = vld [vmem:[%s1023_s13 + $0x8] sm:$0xff]  ;;  %v230_v9 = vld [vmem:[%s1023_s13 + $0x10] sm:$0xff] }
   0xf   : > { %855 = vmatpush3.msra.mxu0 %v246_v1  ;;  %925 = vmatprep.subr.mxu1 %v471_v4  ;;  %v231_v10 = vld [vmem:[%s1023_s13 + $0x18] sm:$0xff]  ;;  %v232_v12 = vld [vmem:[%s1023_s13 + $0x20] sm:$0xff]  ;;  %v233_v13 = vld [vmem:[%s1023_s13 + $0x28] sm:$0xff] }
  0x10   : > { %856 = vmatprep.subr.mxu0 %v245_v3  ;;  %933 = vmatpush3.msra.mxu1 %v471_v4  ;;  %v234_v14 = vld [vmem:[%s1023_s13 + $0x30] sm:$0xff]  ;;  %v235_v15 = vld [vmem:[%s1023_s13 + $0x38] sm:$0xff]  ;;  %v236_v16 = vld [vmem:[%s1023_s13 + $0x40] sm:$0xff] }
  0x11   : > { %857 = vmatpush3.msra.mxu0 %v245_v3  ;;  %926 = vmatprep.subr.mxu1 %v470_v6  ;;  %v237_v17 = vld [vmem:[%s1023_s13 + $0x48] sm:$0xff]  ;;  %v238_v18 = vld [vmem:[%s1023_s13 + $0x50] sm:$0xff]  ;;  %v239_v19 = vld [vmem:[%s1023_s13 + $0x58] sm:$0xff] }
  0x12   : > { %858 = vmatprep.subr.mxu0 %v244_v5  ;;  %934 = vmatpush3.msra.mxu1 %v470_v6  ;;  %v240_v20 = vld [vmem:[%s1023_s13 + $0x60] sm:$0xff]  ;;  %v241_v21 = vld [vmem:[%s1023_s13 + $0x68] sm:$0xff]  ;;  %v242_v22 = vld [vmem:[%s1023_s13 + $0x70] sm:$0xff] }
  0x13   : > { %859 = vmatpush3.msra.mxu0 %v244_v5  ;;  %860 = vmatprep.mubr.msk.f32.mxu0 %vm255_vm0, %v228_v7  ;;  %v243_v23 = vld [vmem:[%s1023_s13 + $0x78] sm:$0xff]  ;;  %v467_v25 = vld [vmem:[%s1157_s3 + $0x10] sm:$0xff]  ;;  %v466_v26 = vld [vmem:[%s1157_s3 + $0x8] sm:$0xff] }
  0x14   : > { %861 = vmatmul.mubr.msk.f32.vlgmr.msra.gmra.mxu0 %vm255_vm0, %v229_v8  ;;  %884 = vmatprep.subr.mxu0 %v472_v2  ;;  %v465_v27 = vld [vmem:[%s1157_s3] sm:$0xff] }
  0x15   : > { %863 = vmatprep.mubr.msk.f32.mxu0 %vm255_vm0, %v230_v9  ;;  %885 = vmatpush3.msra.mxu0 %v472_v2  ;;  %v772_v28 = vld [vmem:[%s1156_s2] ss:$0 sm:$0xff] }
  0x16   : > { %886 = vmatprep.subr.mxu0 %v471_v4  ;;  %927 = vmatprep.subr.mxu1 %v469_v11 }
  0x17   : > { %887 = vmatpush3.msra.mxu0 %v471_v4  ;;  %935 = vmatpush3.msra.mxu1 %v469_v11 }
  0x18   : > { %864 = vmatmul.mubr.msk.f32.gmra.mxu0 %vm255_vm0, %v231_v10  ;;  %888 = vmatprep.subr.mxu0 %v470_v6 }
  0x19   : > { %866 = vmatprep.mubr.msk.f32.mxu0 %vm255_vm0, %v232_v12  ;;  %889 = vmatpush3.msra.mxu0 %v470_v6 }
  0x1a   : > { %890 = vmatprep.subr.mxu0 %v469_v11  ;;  %928 = vmatprep.subr.mxu1 %v468_v24 }
  0x1b   : > { %891 = vmatpush3.msra.mxu0 %v469_v11  ;;  %936 = vmatpush3.msra.mxu1 %v468_v24 }
  0x1c   : > { %867 = vmatmul.mubr.msk.f32.gmra.mxu0 %vm255_vm0, %v233_v13  ;;  %892 = vmatprep.subr.mxu0 %v468_v24  ;;  %v1094_v13 = vld [vmem:[%s1158_s4] ss:$0 sm:$0xff] }
  0x1d   : > { %869 = vmatprep.mubr.msk.f32.mxu0 %vm255_vm0, %v234_v14  ;;  %893 = vmatpush3.msra.mxu0 %v468_v24 }
  0x1e   : > { %894 = vmatprep.subr.mxu0 %v467_v25  ;;  %929 = vmatprep.subr.mxu1 %v467_v25 }
  0x1f   : > { %895 = vmatpush3.msra.mxu0 %v467_v25  ;;  %937 = vmatpush3.msra.mxu1 %v467_v25 }
  0x20   : > { %870 = vmatmul.mubr.msk.f32.gmra.mxu0 %vm255_vm0, %v235_v15  ;;  %896 = vmatprep.subr.mxu0 %v466_v26 }
  0x21   : > { %872 = vmatprep.mubr.msk.f32.mxu0 %vm255_vm0, %v236_v16  ;;  %930 = vmatprep.subr.mxu1 %v466_v26 }
  0x22   : > { %897 = vmatpush3.msra.mxu0 %v466_v26  ;;  %938 = vmatpush3.msra.mxu1 %v466_v26 }
  0x23   : > { %898 = vmatprep.subr.mxu0 %v465_v27  ;;  %931 = vmatprep.subr.mxu1 %v465_v27 }
  0x24   : > { %873 = vmatmul.mubr.msk.f32.gmra.mxu0 %vm255_vm0, %v237_v17  ;;  %939 = vmatpush3.msra.mxu1 %v465_v27 }
  0x25   : > { %875 = vmatprep.mubr.msk.f32.mxu0 %vm255_vm0, %v238_v18  ;;  %899 = vmatpush3.msra.mxu0 %v465_v27 }
  0x28   : > { %876 = vmatmul.mubr.msk.f32.gmra.mxu0 %vm255_vm0, %v239_v19 }
  0x29   : > { %878 = vmatprep.mubr.msk.f32.mxu0 %vm255_vm0, %v240_v20 }
  0x2c   : > { %879 = vmatmul.mubr.msk.f32.gmra.mxu0 %vm255_vm0, %v241_v21 }
  0x2d   : > { %881 = vmatprep.mubr.msk.f32.mxu0 %vm255_vm0, %v242_v22 }
  0x30   : > { %882 = vmatmul.mubr.msk.f32.gmra.mxu0 %vm255_vm0, %v243_v23 }
  0xd4   : > { %v862_v29 = vpop.f32.mrf.mxu0 }
  0xd5   : > { %v376_v30 = vadd.f32 %v862_v29, %v772_v28 }
  0xd6   : > { %v370_v31 = vpop.f32.mrf.mxu0 }
  0xd7   : > { %v371_v32 = vadd.f32 %v772_v28, %v370_v31  ;;  %v450_v35 = vmax.f32 %v376_v30, 0.0 }
  0xd8   : > { %v865_v33 = vpop.f32.mrf.mxu0 }
  0xd9   : > { %v449_v34 = vmax.f32 %v371_v32, 0.0  ;;  %v386_v36 = vadd.f32 %v865_v33, %v772_v28 }
  0xda   : > { %v380_v37 = vpop.f32.mrf.mxu0 }
  0xdb   : > { %v381_v38 = vadd.f32 %v772_v28, %v380_v37  ;;  %900 = vmatprep.mubr.msk.f32.mxu0 %vm480_vm1, %v449_v34  ;;  %v452_v41 = vmax.f32 %v386_v36, 0.0 }
  0xdc   : > { %v868_v39 = vpop.f32.mrf.mxu0  ;;  %901 = vmatmul.mubr.msk.f32.vlgmr.msra.gmra.mxu0 %vm480_vm1, %v450_v35 }
  0xdd   : > { %v451_v40 = vmax.f32 %v381_v38, 0.0  ;;  %v396_v42 = vadd.f32 %v868_v39, %v772_v28 }
  0xde   : > { %v390_v43 = vpop.f32.mrf.mxu0 }
  0xdf   : > { %v391_v44 = vadd.f32 %v772_v28, %v390_v43  ;;  %903 = vmatprep.mubr.msk.f32.mxu1 %vm480_vm1, %v451_v40  ;;  %v454_v47 = vmax.f32 %v396_v42, 0.0 }
  0xe0   : > { %v871_v45 = vpop.f32.mrf.mxu0  ;;  %904 = vmatmul.mubr.msk.f32.vlgmr.msra.gmra.mxu1 %vm480_vm1, %v452_v41 }
  0xe1   : > { %v453_v46 = vmax.f32 %v391_v44, 0.0  ;;  %v406_v48 = vadd.f32 %v871_v45, %v772_v28 }
  0xe2   : > { %v400_v49 = vpop.f32.mrf.mxu0 }
  0xe3   : > { %v401_v50 = vadd.f32 %v772_v28, %v400_v49  ;;  %906 = vmatprep.mubr.msk.f32.mxu1 %vm480_vm1, %v453_v46  ;;  %v456_v53 = vmax.f32 %v406_v48, 0.0 }
  0xe4   : > { %v874_v51 = vpop.f32.mrf.mxu0  ;;  %907 = vmatmul.mubr.msk.f32.gmra.mxu1 %vm480_vm1, %v454_v47 }
  0xe5   : > { %v455_v52 = vmax.f32 %v401_v50, 0.0  ;;  %v416_v54 = vadd.f32 %v874_v51, %v772_v28 }
  0xe6   : > { %v410_v55 = vpop.f32.mrf.mxu0 }
  0xe7   : > { %v411_v56 = vadd.f32 %v772_v28, %v410_v55  ;;  %909 = vmatprep.mubr.msk.f32.mxu1 %vm480_vm1, %v455_v52  ;;  %v458_v59 = vmax.f32 %v416_v54, 0.0 }
  0xe8   : > { %v877_v57 = vpop.f32.mrf.mxu0  ;;  %910 = vmatmul.mubr.msk.f32.gmra.mxu1 %vm480_vm1, %v456_v53 }
  0xe9   : > { %v457_v58 = vmax.f32 %v411_v56, 0.0  ;;  %v426_v60 = vadd.f32 %v877_v57, %v772_v28 }
  0xea   : > { %v420_v61 = vpop.f32.mrf.mxu0 }
  0xeb   : > { %v421_v62 = vadd.f32 %v772_v28, %v420_v61  ;;  %912 = vmatprep.mubr.msk.f32.mxu1 %vm480_vm1, %v457_v58  ;;  %v460_v1 = vmax.f32 %v426_v60, 0.0 }
  0xec   : > { %v880_v63 = vpop.f32.mrf.mxu0  ;;  %913 = vmatmul.mubr.msk.f32.gmra.mxu1 %vm480_vm1, %v458_v59 }
  0xed   : > { %v459_v0 = vmax.f32 %v421_v62, 0.0  ;;  %v436_v2 = vadd.f32 %v880_v63, %v772_v28 }
  0xee   : > { %v430_v3 = vpop.f32.mrf.mxu0 }
  0xef   : > { %v431_v4 = vadd.f32 %v772_v28, %v430_v3  ;;  %915 = vmatprep.mubr.msk.f32.mxu1 %vm480_vm1, %v459_v0  ;;  %v462_v7 = vmax.f32 %v436_v2, 0.0 }
  0xf0   : > { %v883_v5 = vpop.f32.mrf.mxu0  ;;  %916 = vmatmul.mubr.msk.f32.gmra.mxu1 %vm480_vm1, %v460_v1 }
  0xf1   : > { %v461_v6 = vmax.f32 %v431_v4, 0.0  ;;  %v446_v8 = vadd.f32 %v883_v5, %v772_v28 }
  0xf2   : > { %v440_v9 = vpop.f32.mrf.mxu0 }
  0xf3   : > { %v441_v10 = vadd.f32 %v772_v28, %v440_v9  ;;  %918 = vmatprep.mubr.msk.f32.mxu1 %vm480_vm1, %v461_v6  ;;  %v464_v12 = vmax.f32 %v446_v8, 0.0 }
  0xf4   : > { %919 = vmatmul.mubr.msk.f32.gmra.mxu1 %vm480_vm1, %v462_v7 }
  0xf5   : > { %v463_v11 = vmax.f32 %v441_v10, 0.0 }
  0xf7   : > { %921 = vmatprep.mubr.msk.f32.mxu1 %vm480_vm1, %v463_v11 }
  0xf8   : > { %922 = vmatmul.mubr.msk.f32.gmra.mxu1 %vm480_vm1, %v464_v12 }
 0x19c   : > { %v902_v14 = vpop.f32.mrf.mxu0 }
 0x19d   : > { %v601_v15 = vadd.f32 %v902_v14, %v1094_v13 }
 0x19e   : > { %v595_v16 = vpop.f32.mrf.mxu0 }
 0x19f   : > { %v675_v17 = vmax.f32 %v601_v15, 0.0  ;;  %v596_v18 = vadd.f32 %v1094_v13, %v595_v16 }
 0x1a0   : > { %v905_v19 = vpop.f32.mrf.mxu1 }
 0x1a1   : > { %692 = vst.msk [vmem:[%s1102_s7 + $0x8] sm:$0xff] %vm690_vm2, %v675_v17  ;;  %v674_v20 = vmax.f32 %v596_v18, 0.0  ;;  %v611_v21 = vadd.f32 %v905_v19, %v1094_v13 }
 0x1a2   : > { %v605_v22 = vpop.f32.mrf.mxu1 }
 0x1a3   : > { %691 = vst.msk [vmem:[%s1102_s7] sm:$0xff] %vm690_vm2, %v674_v20  ;;  %v677_v23 = vmax.f32 %v611_v21, 0.0  ;;  %v606_v24 = vadd.f32 %v1094_v13, %v605_v22 }
 0x1a4   : > { %v908_v25 = vpop.f32.mrf.mxu1 }
 0x1a5   : > { %694 = vst.msk [vmem:[%s1102_s7 + $0x18] sm:$0xff] %vm690_vm2, %v677_v23  ;;  %v676_v26 = vmax.f32 %v606_v24, 0.0  ;;  %v621_v27 = vadd.f32 %v908_v25, %v1094_v13 }
 0x1a6   : > { %v615_v28 = vpop.f32.mrf.mxu1 }
 0x1a7   : > { %693 = vst.msk [vmem:[%s1102_s7 + $0x10] sm:$0xff] %vm690_vm2, %v676_v26  ;;  %v679_v29 = vmax.f32 %v621_v27, 0.0  ;;  %v616_v30 = vadd.f32 %v1094_v13, %v615_v28 }
 0x1a8   : > { %v911_v31 = vpop.f32.mrf.mxu1 }
 0x1a9   : > { %696 = vst.msk [vmem:[%s1102_s7 + $0x28] sm:$0xff] %vm690_vm2, %v679_v29  ;;  %v678_v32 = vmax.f32 %v616_v30, 0.0  ;;  %v631_v33 = vadd.f32 %v911_v31, %v1094_v13 }
 0x1aa   : > { %v625_v34 = vpop.f32.mrf.mxu1 }
 0x1ab   : > { %695 = vst.msk [vmem:[%s1102_s7 + $0x20] sm:$0xff] %vm690_vm2, %v678_v32  ;;  %v681_v35 = vmax.f32 %v631_v33, 0.0  ;;  %v626_v36 = vadd.f32 %v1094_v13, %v625_v34 }
 0x1ac   : > { %v914_v37 = vpop.f32.mrf.mxu1 }
 0x1ad   : > { %698 = vst.msk [vmem:[%s1102_s7 + $0x38] sm:$0xff] %vm690_vm2, %v681_v35  ;;  %v680_v38 = vmax.f32 %v626_v36, 0.0  ;;  %v641_v39 = vadd.f32 %v914_v37, %v1094_v13 }
 0x1ae   : > { %v635_v40 = vpop.f32.mrf.mxu1 }
 0x1af   : > { %697 = vst.msk [vmem:[%s1102_s7 + $0x30] sm:$0xff] %vm690_vm2, %v680_v38  ;;  %v683_v41 = vmax.f32 %v641_v39, 0.0  ;;  %v636_v42 = vadd.f32 %v1094_v13, %v635_v40 }
 0x1b0   : > { %v917_v43 = vpop.f32.mrf.mxu1 }
 0x1b1   : > { %700 = vst.msk [vmem:[%s1102_s7 + $0x48] sm:$0xff] %vm690_vm2, %v683_v41  ;;  %v682_v44 = vmax.f32 %v636_v42, 0.0  ;;  %v651_v45 = vadd.f32 %v917_v43, %v1094_v13 }
 0x1b2   : > { %v645_v46 = vpop.f32.mrf.mxu1 }
 0x1b3   : > { %699 = vst.msk [vmem:[%s1102_s7 + $0x40] sm:$0xff] %vm690_vm2, %v682_v44  ;;  %v685_v47 = vmax.f32 %v651_v45, 0.0  ;;  %v646_v48 = vadd.f32 %v1094_v13, %v645_v46 }
 0x1b4   : > { %v920_v49 = vpop.f32.mrf.mxu1 }
 0x1b5   : > { %702 = vst.msk [vmem:[%s1102_s7 + $0x58] sm:$0xff] %vm690_vm2, %v685_v47  ;;  %v684_v50 = vmax.f32 %v646_v48, 0.0  ;;  %v661_v51 = vadd.f32 %v920_v49, %v1094_v13 }
 0x1b6   : > { %v655_v52 = vpop.f32.mrf.mxu1 }
 0x1b7   : > { %701 = vst.msk [vmem:[%s1102_s7 + $0x50] sm:$0xff] %vm690_vm2, %v684_v50  ;;  %v687_v53 = vmax.f32 %v661_v51, 0.0  ;;  %v656_v54 = vadd.f32 %v1094_v13, %v655_v52 }
 0x1b8   : > { %v923_v55 = vpop.f32.mrf.mxu1 }
 0x1b9   : > { %704 = vst.msk [vmem:[%s1102_s7 + $0x68] sm:$0xff] %vm690_vm2, %v687_v53  ;;  %v686_v56 = vmax.f32 %v656_v54, 0.0  ;;  %v671_v57 = vadd.f32 %v923_v55, %v1094_v13 }
 0x1ba   : > { %v665_v58 = vpop.f32.mrf.mxu1 }
 0x1bb   : > { %703 = vst.msk [vmem:[%s1102_s7 + $0x60] sm:$0xff] %vm690_vm2, %v686_v56  ;;  %v689_v59 = vmax.f32 %v671_v57, 0.0  ;;  %v666_v60 = vadd.f32 %v1094_v13, %v665_v58 }
 0x1bd   : > { %706 = vst.msk [vmem:[%s1102_s7 + $0x78] sm:$0xff] %vm690_vm2, %v689_v59  ;;  %v688_v61 = vmax.f32 %v666_v60, 0.0 }
 0x1bf   : > { %705 = vst.msk [vmem:[%s1102_s7 + $0x70] sm:$0xff] %vm690_vm2, %v688_v61 }
 0x1c0 PF: > { %s15_s18 = sadd.s32 1, %s954_s18  }
 0x1c1   : > { %p12_p4 = scmp.ge.s32.totalorder %s15_s18, 4  }
 0x1c3   :  { %14 = sbr.rel (!%p12_p4) target bundleno = 1 (0x1), region = 70 }

</bundles_post_ra>
